<compile_context>
chip_gen: v6e
topology: v6e:2x2x1
jax: 0.10.0
libtpu: 0.0.40
codegen_flags: <defaults>
</compile_context>

<pallas_src>
import functools
import math

import jax
import jax.numpy as jnp
from jax.experimental import pallas as pl
from jax.experimental.pallas import tpu as pltpu


def _graph_trans_kernel(adj_ref, x_ref, w_ref, o_ref, *, apply_relu, ax_first):
    # adj_ref : (E, Bn)        batch-invariant adjacency (raw, pre-normalization)
    # x_ref   : (B, Bn, Fin)   full batch of inputs
    # w_ref   : (Fin, Fout)    weight
    # o_ref   : (B, E, Fout)   output

    # --- norm_trans_adj: softmax(relu(adj), dim=-1) — computed exactly once ---
    adj = jnp.maximum(adj_ref[...].astype(jnp.float32), 0.0)
    m = jnp.max(adj, axis=-1, keepdims=True)
    e = jnp.exp(adj - m)
    denom = jnp.sum(e, axis=-1, keepdims=True)
    # Multiply by an EUP reciprocal instead of a VALU divide.
    a = e * pl.reciprocal(denom, approx=True)                      # (E, Bn) f32

    x = x_ref[...]                                                  # (B, Bn, Fin) native dtype
    w = w_ref[...]                                                  # (Fin, Fout)  native dtype
    B = x.shape[0]

    # Broadcast the (small) batch-invariant operands so both contractions are
    # plain batched matmuls (rank-3 with one batch dim) — MXU-native pattern.
    a_b = jnp.broadcast_to(a.astype(x.dtype), (B,) + a.shape)       # (B, E, Bn)
    w_b = jnp.broadcast_to(w, (B,) + w.shape)                       # (B, Fin, Fout)

    if ax_first:
        # (A @ X) @ W : fewer FLOPs and smaller intermediate when E < Bn.
        ax = jnp.einsum("ben,bnf->bef", a_b, x,
                        preferred_element_type=jnp.float32)         # (B, E, Fin) f32
        out = jnp.einsum("bef,bfo->beo", ax.astype(w.dtype), w_b,
                         preferred_element_type=jnp.float32)        # (B, E, Fout) f32
    else:
        # A @ (X @ W) : better when E >= Bn.
        support = jnp.einsum("bnf,bfo->bno", x, w_b,
                             preferred_element_type=jnp.float32)    # (B, Bn, Fout) f32
        out = jnp.einsum("ben,bnf->bef", a_b, support.astype(x.dtype),
                         preferred_element_type=jnp.float32)        # (B, E, Fout) f32

    if apply_relu:
        out = jnp.maximum(out, 0.0)

    o_ref[...] = out.astype(o_ref.dtype)


def graph_trans_forward(x, weight, adj, relu=False):
    """x: (B, begin_nodes, Fin); weight: (Fin, Fout); adj: (end_nodes, begin_nodes)."""
    B, Bn, Fin = x.shape
    Fin_w, Fout = weight.shape
    E, Bn_a = adj.shape
    assert Fin == Fin_w and Bn == Bn_a

    # Associativity choice at trace time (feedback #3).
    ax_first = E < Bn
    if ax_first:
        flops = 2 * B * E * (Bn * Fin + Fin * Fout)
    else:
        flops = 2 * B * (Bn * Fin * Fout + E * Bn * Fout)
    bytes_accessed = int(
        adj.size * adj.dtype.itemsize
        + x.size * x.dtype.itemsize
        + weight.size * weight.dtype.itemsize
        + B * E * Fout * x.dtype.itemsize
    )

    kernel = functools.partial(_graph_trans_kernel, apply_relu=relu, ax_first=ax_first)

    return pl.pallas_call(
        kernel,
        out_shape=jax.ShapeDtypeStruct((B, E, Fout), x.dtype),
        grid=(1,),
        in_specs=[
            pl.BlockSpec((E, Bn), lambda i: (0, 0)),          # adj (full, loaded once)
            pl.BlockSpec((B, Bn, Fin), lambda i: (0, 0, 0)),  # x   (full batch)
            pl.BlockSpec((Fin, Fout), lambda i: (0, 0)),      # weight (full)
        ],
        out_specs=pl.BlockSpec((B, E, Fout), lambda i: (0, 0, 0)),
        compiler_params=pltpu.CompilerParams(
            dimension_semantics=("arbitrary",),
            vmem_limit_bytes=32 * 1024 * 1024,
        ),
        cost_estimate=pl.CostEstimate(
            flops=int(flops),
            transcendentals=int(E * (Bn + 1)),   # exps + reciprocals
            bytes_accessed=bytes_accessed,
        ),
    )(adj, x, weight)


def _reference(x, weight, adj, relu=False):
    a = jnp.maximum(adj, 0.0)
    a = jax.nn.softmax(a, axis=-1)
    support = jnp.matmul(x, weight)
    out = jnp.matmul(a, support)
    if relu:
        out = jnp.maximum(out, 0.0)
    return out


if __name__ == "__main__":
    key = jax.random.PRNGKey(0)
    k_x, k_w, k_adj = jax.random.split(key, 3)

    # Small shapes consistent with the module defaults.
    batch = 2
    begin_nodes = 7
    end_nodes = 2
    in_features = 32
    out_features = 32

    x = jax.random.normal(k_x, (batch, begin_nodes, in_features), dtype=jnp.float32)

    # Deterministic Xavier-uniform init for weight (as reset_parameters would do).
    limit = math.sqrt(6.0 / (in_features + out_features))
    weight = jax.random.uniform(
        k_w, (in_features, out_features), minval=-limit, maxval=limit, dtype=jnp.float32
    )

    # Deterministic init for the learnable adj parameter (end_nodes, begin_nodes).
    adj = jax.random.normal(k_adj, (end_nodes, begin_nodes), dtype=jnp.float32)

    # Tolerance is relaxed slightly vs f32 exact because the softmax denominator
    # uses the EUP approximate reciprocal (pl.reciprocal(approx=True)).
    ATOL = RTOL = 5e-3

    out = jax.block_until_ready(graph_trans_forward(x, weight, adj, relu=False))
    ref = _reference(x, weight, adj, relu=False)
    assert out.shape == (batch, end_nodes, out_features)
    assert jnp.allclose(out, ref, atol=ATOL, rtol=RTOL), "mismatch vs reference (relu=False)"

    out_r = jax.block_until_ready(graph_trans_forward(x, weight, adj, relu=True))
    ref_r = _reference(x, weight, adj, relu=True)
    assert jnp.allclose(out_r, ref_r, atol=ATOL, rtol=RTOL), "mismatch vs reference (relu=True)"

    print("KERNEL_OK")
</pallas_src>

<mosaic_0001>
module attributes {stable_mosaic.version = 11 : i64} {
  func.func @_graph_trans_kernel(%arg0: i32, %arg1: memref<2x7xf32, #tpu.memory_space<vmem>>, %arg2: memref<2x7x32xf32, #tpu.memory_space<vmem>>, %arg3: memref<32x32xf32, #tpu.memory_space<vmem>>, %arg4: memref<2x2x32xf32, #tpu.memory_space<vmem>>) attributes {dimension_semantics = [#tpu.dimension_semantics<arbitrary>], iteration_bounds = array<i64: 1>, scalar_prefetch = 0 : i64, scratch_operands = 0 : i64, tpu.core_type = #tpu.core_type<tc>, window_params = [{pipeline_mode = #tpu.pipeline_mode<synchronous>, transform_indices = @transform_0, window_bounds = array<i64: 2, 7>}, {pipeline_mode = #tpu.pipeline_mode<synchronous>, transform_indices = @transform_1, window_bounds = array<i64: 2, 7, 32>}, {pipeline_mode = #tpu.pipeline_mode<synchronous>, transform_indices = @transform_2, window_bounds = array<i64: 32, 32>}, {pipeline_mode = #tpu.pipeline_mode<synchronous>, transform_indices = @transform_3, window_bounds = array<i64: 2, 2, 32>}]} {
    %c0 = arith.constant 0 : index
    %c0_0 = arith.constant 0 : index
    %0 = vector.load %arg1[%c0, %c0_0] : memref<2x7xf32, #tpu.memory_space<vmem>>, vector<2x7xf32>
    %cst = arith.constant 0.000000e+00 : f32
    %1 = vector.broadcast %cst : f32 to vector<2x7xf32>
    %2 = arith.maximumf %0, %1 : vector<2x7xf32>
    %cst_1 = arith.constant dense<0xFF800000> : vector<2xf32>
    %3 = vector.multi_reduction <maximumf>, %2, %cst_1 [1] : vector<2x7xf32> to vector<2xf32>
    %4 = vector.shape_cast %3 : vector<2xf32> to vector<2x1xf32>
    %5 = vector.broadcast %4 : vector<2x1xf32> to vector<2x7xf32>
    %6 = arith.subf %2, %5 : vector<2x7xf32>
    %7 = math.exp %6 : vector<2x7xf32>
    %cst_2 = arith.constant dense<0.000000e+00> : vector<2xf32>
    %8 = vector.multi_reduction <add>, %7, %cst_2 [1] : vector<2x7xf32> to vector<2xf32>
    %9 = vector.shape_cast %8 : vector<2xf32> to vector<2x1xf32>
    %10 = tpu.reciprocal %9 {approx = true} : vector<2x1xf32> -> vector<2x1xf32>
    %11 = vector.broadcast %10 : vector<2x1xf32> to vector<2x7xf32>
    %12 = arith.mulf %7, %11 : vector<2x7xf32>
    %c0_3 = arith.constant 0 : index
    %c0_4 = arith.constant 0 : index
    %c0_5 = arith.constant 0 : index
    %13 = vector.load %arg2[%c0_3, %c0_4, %c0_5] : memref<2x7x32xf32, #tpu.memory_space<vmem>>, vector<2x7x32xf32>
    %c0_6 = arith.constant 0 : index
    %c0_7 = arith.constant 0 : index
    %14 = vector.load %arg3[%c0_6, %c0_7] : memref<32x32xf32, #tpu.memory_space<vmem>>, vector<32x32xf32>
    %15 = vector.shape_cast %12 : vector<2x7xf32> to vector<1x2x7xf32>
    %16 = vector.broadcast %15 : vector<1x2x7xf32> to vector<2x2x7xf32>
    %17 = vector.shape_cast %14 : vector<32x32xf32> to vector<1x32x32xf32>
    %18 = vector.broadcast %17 : vector<1x32x32xf32> to vector<2x32x32xf32>
    "tpu.trace_start"() <{level = 10 : i32, message = "ben,bnf->bef"}> : () -> ()
    %cst_8 = arith.constant dense<0.000000e+00> : vector<2x2x32xf32>
    %19 = tpu.matmul %16, %13, %cst_8 {dimension_numbers = #tpu.dot_dimension_numbers<[2], [1], [1], [2], [0, 0, 0, 1, 1, 2], [0], [0]>} : vector<2x2x7xf32>, vector<2x7x32xf32>, vector<2x2x32xf32> -> vector<2x2x32xf32>
    "tpu.trace_stop"() : () -> ()
    "tpu.trace_start"() <{level = 10 : i32, message = "bef,bfo->beo"}> : () -> ()
    %cst_9 = arith.constant dense<0.000000e+00> : vector<2x2x32xf32>
    %20 = tpu.matmul %19, %18, %cst_9 {dimension_numbers = #tpu.dot_dimension_numbers<[2], [1], [1], [2], [0, 0, 0, 1, 1, 2], [0], [0]>} : vector<2x2x32xf32>, vector<2x32x32xf32>, vector<2x2x32xf32> -> vector<2x2x32xf32>
    "tpu.trace_stop"() : () -> ()
    %c0_10 = arith.constant 0 : index
    %c0_11 = arith.constant 0 : index
    %c0_12 = arith.constant 0 : index
    %21 = vector.load %arg4[%c0_10, %c0_11, %c0_12] : memref<2x2x32xf32, #tpu.memory_space<vmem>>, vector<2x2x32xf32>
    tpu.vector_store %arg4[%c0_10, %c0_11, %c0_12], %20 {strides = array<i32>} : memref<2x2x32xf32, #tpu.memory_space<vmem>>, vector<2x2x32xf32>,
    return
  }
  func.func @transform_0(%arg0: i32) -> (i32, i32) {
    %c0_i32 = arith.constant 0 : i32
    %c0_i32_0 = arith.constant 0 : i32
    %c0_i32_1 = arith.constant 0 : i32
    return %c0_i32, %c0_i32_0 : i32, i32
  }
  func.func @transform_1(%arg0: i32) -> (i32, i32, i32) {
    %c0_i32 = arith.constant 0 : i32
    %c0_i32_0 = arith.constant 0 : i32
    %c0_i32_1 = arith.constant 0 : i32
    %c0_i32_2 = arith.constant 0 : i32
    return %c0_i32, %c0_i32_0, %c0_i32_1 : i32, i32, i32
  }
  func.func @transform_2(%arg0: i32) -> (i32, i32) {
    %c0_i32 = arith.constant 0 : i32
    %c0_i32_0 = arith.constant 0 : i32
    %c0_i32_1 = arith.constant 0 : i32
    return %c0_i32, %c0_i32_0 : i32, i32
  }
  func.func @transform_3(%arg0: i32) -> (i32, i32, i32) {
    %c0_i32 = arith.constant 0 : i32
    %c0_i32_0 = arith.constant 0 : i32
    %c0_i32_1 = arith.constant 0 : i32
    %c0_i32_2 = arith.constant 0 : i32
    return %c0_i32, %c0_i32_0, %c0_i32_1 : i32, i32, i32
  }
}

</mosaic_0001>

<bundles_post_ra>
// kernel: tpu_custom_call.1
= control target key start
LH: loop header
LB: loop body
LE: loop exit
PB: predicated region body
PF: predicated region fallthrough
CT: control target
= control target key end

     0   :  { %8 = vsyncpa [#allocation3], 0  ;;  %s525_s0 = inlined_call_operand.hbm [shape: f32[2,7], index: 0, kind: input, shape index: {}]   ;;  %s526_s1 = inlined_call_operand.vmem [shape: f32[2,7,32], index: 1, kind: input, shape index: {}]   ;;  %s527_s2 = inlined_call_operand.vmem [shape: f32[32,32], index: 2, kind: input, shape index: {}]   ;;  %s528_s3 = inlined_call_operand.hbm [shape: f32[2,2,32], index: 3, kind: output, shape index: {}]  }
   0x1   :  { %9 = vsyncpa [#allocation4], 0  ;;  %s471_s12 = smov [#allocation2]  }
   0x2   :  { %s16_s13 = sshll.u32 %s471_s12, 4  ;;  %s17_s13 = int_to_ptr.vmem [resolvable:$true] %s16_s13 }
   0x3   :  { %s435_s14 = scalar_lea.vmem %s17_s13, 32  ;;  %p440_p1 = scmp.lt.s32.totalorder %s17_s13, %s17_s13 }
   0x4   :  { %p436_p0 = scmp.ne.s32.totalorder %s17_s13, %s435_s14  ;;  %p441_p2 = scmp.lt.s32.totalorder %s435_s14, %s435_s14 }
   0x6   :  { %p442_p3 = por %p441_p2, %p440_p1 }
   0x8   :  { %p443_p4 = pnand %p442_p3, %p436_p0 }
   0xa   :  { %446 = shalt.err (!%p443_p4)
}
   0xb   :  { %19 = dma.hbm_to_vmem [thread:$0]  %s525_s0, 32, %s17_s13, [#allocation3]  }
   0xc   :  { %467 = dma.done.wait [#allocation3], 32  }
   0xd   :  { %468 = vsyncadd [#allocation3], 4294967264  ;;  %v27_v0 = vld [vmem:[#allocation2] sm:$0x3]  ;;  %vm29_vm0 = vcmask 50176   ;;  %vm51_vm1 = vcmask 1046528  }
   0xe   :  { %v28_v1 = vmax.f32 %v27_v0, 0.0  ;;  %v41_v8 = vld [vmem:[%s526_s1] sm:$0x7f]  ;;  %v472_v9 = vmov 0.0   ;;  %v42_v10 = vld [vmem:[%s526_s1 + $0x8] sm:$0x7f] }
   0xf   :  { %385 = vmatprep.subr.mxu0 %v472_v9  ;;  %390 = vmatprep.subr.mxu1 %v472_v9  ;;  %vm473_vm2 = vmmov 0   ;;  %vm47_vm3 = vcmask 56320   ;;  %v46_v14 = vld [vmem:[%s527_s2 + $0x18] sm:$0xff]  ;;  %v45_v15 = vld [vmem:[%s527_s2 + $0x10] sm:$0xff]  ;;  %v44_v16 = vld [vmem:[%s527_s2 + $0x8] sm:$0xff]  ;;  %vm198_vm4 = vcmask 261120  }
  0x10   :  { %v30_v2 = vsel %vm29_vm0, %v28_v1, -inf  ;;  %386 = vmatpush3.msk.msra.mxu0 %vm51_vm1, %v41_v8  ;;  %387 = vmatprep.mubr.msk.f32.mxu0 %vm473_vm2, %v472_v9  ;;  %v43_v17 = vld [vmem:[%s527_s2] sm:$0xff]  ;;  %s474_s27 = smov [#allocation5]   ;;  %vm345_vm5 = vcmask 254976  }
  0x11   :  { %31 = vmax.xlane.f32.xlu0 %v30_v2  ;;  %391 = vmatpush3.msk.msra.mxu1 %vm51_vm1, %v42_v10  ;;  %s353_s28 = sshll.u32 %s474_s27, 4  ;;  %s354_s28 = int_to_ptr.vmem [resolvable:$true] %s353_s28 }
  0x12   :  { %392 = vmatprep.mubr.msk.f32.mxu1 %vm473_vm2, %v472_v9  ;;  %395 = vmatprep.subr.mxu0 %v472_v9  ;;  %s447_s2 = scalar_lea.vmem %s354_s28, 64  ;;  %p452_p6 = scmp.lt.s32.totalorder %s354_s28, %s354_s28 }
  0x13   :  { %406 = vmatprep.subr.mxu1 %v472_v9  ;;  %p448_p5 = scmp.ne.s32.totalorder %s354_s28, %s447_s2  ;;  %p453_p7 = scmp.lt.s32.totalorder %s447_s2, %s447_s2 }
  0x15   :  { %p454_p8 = por %p453_p7, %p452_p6 }
  0x17   :  { %p455_p9 = pnand %p454_p8, %p448_p5 }
  0x9a   :  { %v32_v3 = vpop.xlane.xlu0 %31 }
  0x9b   :  { %v33_v4 = vsub.f32 %v28_v1, %v32_v3 }
  0x9d   :  { %v34_v5 = vmul.f32 1.442695, %v33_v4 }
  0x9f   :  { %423 = vpow2.f32 %v34_v5 }
  0xac   :  { %v424_v6 = vpop.eup %423 }
  0xad   :  { %v36_v7 = vsel %vm29_vm0, %v424_v6, 0.0 }
  0xae   :  { %37 = vadd.xlane.f32.xlu0 %v36_v7 }
 0x137   :  { %v38_v11 = vpop.xlane.xlu0 %37 }
 0x138   :  { %425 = vrcp.f32 %v38_v11 }
 0x145   :  { %v426_v12 = vpop.eup %425 }
 0x146   :  { %v40_v13 = vmul.f32 %v426_v12, %v424_v6 }
 0x148   :  { %388 = vmatmul.mubr.msk.f32.vlgmr.msra.gmra.mxu0 %vm47_vm3, %v40_v13  ;;  %393 = vmatmul.mubr.msk.f32.vlgmr.msra.gmra.mxu1 %vm47_vm3, %v40_v13 }
 0x149   :  { %396 = vmatpush3.msra.mxu0 %v46_v14  ;;  %407 = vmatpush3.msra.mxu1 %v46_v14 }
 0x14a   :  { %397 = vmatprep.subr.mxu0 %v472_v9  ;;  %408 = vmatprep.subr.mxu1 %v472_v9 }
 0x14b   :  { %398 = vmatpush3.msra.mxu0 %v45_v15  ;;  %409 = vmatpush3.msra.mxu1 %v45_v15 }
 0x14c   :  { %399 = vmatprep.subr.mxu0 %v472_v9  ;;  %410 = vmatprep.subr.mxu1 %v472_v9 }
 0x14d   :  { %400 = vmatpush3.msra.mxu0 %v44_v16  ;;  %411 = vmatpush3.msra.mxu1 %v44_v16 }
 0x14e   :  { %401 = vmatprep.subr.mxu0 %v472_v9  ;;  %412 = vmatprep.subr.mxu1 %v472_v9 }
 0x14f   :  { %403 = vmatprep.mubr.msk.f32.mxu0 %vm473_vm2, %v472_v9  ;;  %414 = vmatprep.mubr.msk.f32.mxu1 %vm473_vm2, %v472_v9 }
 0x150   :  { %402 = vmatpush3.msra.mxu0 %v43_v17  ;;  %413 = vmatpush3.msra.mxu1 %v43_v17 }
 0x208   :  { %v121_v18 = vpop.f32.mrf.mxu0  ;;  %v194_v19 = vpop.f32.mrf.mxu1 }
 0x209   :  { %404 = vmatmul.mubr.msk.f32.vlgmr.msra.gmra.mxu0 %vm198_vm4, %v121_v18  ;;  %415 = vmatmul.mubr.msk.f32.vlgmr.msra.gmra.mxu1 %vm198_vm4, %v194_v19 }
 0x20a   :  { %v389_v20 = vpop.f32.mrf.mxu0  ;;  %v394_v21 = vpop.f32.mrf.mxu1 }
 0x2c9   :  { %v268_v22 = vpop.f32.mrf.mxu0  ;;  %v341_v23 = vpop.f32.mrf.mxu1 }
 0x2ca   :  { %346 = vst.msk [vmem:[#allocation5] sm:$0x3] %vm345_vm5, %v268_v22  ;;  %347 = vst.msk [vmem:[#allocation5 + $0x2] sm:$0x3] %vm345_vm5, %v341_v23 }
 0x2cb   :  { %v405_v24 = vpop.f32.mrf.mxu0  ;;  %v416_v25 = vpop.f32.mrf.mxu1 }
 0x2cc   :  { %458 = shalt.err (!%p455_p9)
}
 0x2cd   :  { %s475_s29 = smov 32   ;;  %s476_s30 = smov 2  }
 0x2ce   :  { %359 = dma.vmem_to_hbm [thread:$0]  %s354_s28, 64, %s528_s3, [#allocation4], %s475_s29, %s475_s29, %s476_s30  }
 0x2cf   :  { %469 = dma.done.wait [#allocation4], 64  }
 0x2d0   :  { %470 = vsyncadd [#allocation4], 4294967232 }
 0x2d1   :  { %363 = vsyncpa [#allocation3], 1 }
 0x2d2   :  { %364 = vsyncpa [#allocation4], 1 }

</bundles_post_ra>
